<compile_context>
chip_gen: v7x
topology: tpu7x:2x2x1
jax: 0.10.0
libtpu: 0.0.40
codegen_flags: <defaults>
</compile_context>

<pallas_src>
import math
import jax
import jax.numpy as jnp
from jax import lax
from jax.experimental import pallas as pl
from jax.experimental.pallas import tpu as pltpu


def _round_up(x: int, m: int) -> int:
    return ((x + m - 1) // m) * m


def f2_kernel(x_ref, w0_ref, b0_ref, w1_ref, b1_ref, w2_ref, b2_ref, o_ref):
    # All matmuls contract the last dim of both operands (i.e. a @ w.T),
    # accumulate in f32 on the MXU; bias-add / ReLU run in f32 on the VPU.
    dn = (((1,), (1,)), ((), ()))

    # Layer 0: (tn, d) x (h0p, d) -> (tn, h0p)
    z0 = lax.dot_general(x_ref[...], w0_ref[...], dimension_numbers=dn,
                         preferred_element_type=jnp.float32)
    a0 = jnp.maximum(z0 + b0_ref[...], 0.0)

    # Layer 1: (tn, h0p) x (h1p, h0p) -> (tn, h1p)
    z1 = lax.dot_general(a0.astype(jnp.bfloat16), w1_ref[...],
                         dimension_numbers=dn,
                         preferred_element_type=jnp.float32)
    a1 = jnp.maximum(z1 + b1_ref[...], 0.0)

    # Layer 2: (tn, h1p) x (kp, h1p) -> (tn, kp)
    z2 = lax.dot_general(a1.astype(jnp.bfloat16), w2_ref[...],
                         dimension_numbers=dn,
                         preferred_element_type=jnp.float32)
    o_ref[...] = (z2 + b2_ref[...]).astype(o_ref.dtype)


def f2_forward(x, w0, b0, w1, b1, w2, b2, *, block_n: int = 256):
    """Pallas implementation of F2.forward.

    Args:
      x:  (n, d)
      w0: (h0, d), b0: (h0,)
      w1: (h1, h0), b1: (h1,)
      w2: (k, h1), b2: (k,)
    Returns:
      (n, k) float32
    """
    n, d = x.shape
    h0 = w0.shape[0]
    h1 = w1.shape[0]
    k = w2.shape[0]

    # ---- layout plumbing (wrapper side, not the hot path) -------------------
    # Pad hidden dims h0, h1 and class dim k to lane multiples (128) so every
    # matmul operand / intermediate / store is lane-dense. Zero padding is
    # numerically exact (see header comment).
    h0p = _round_up(h0, 128)
    h1p = _round_up(h1, 128)
    kp = _round_up(k, 128)

    w0b = jnp.zeros((h0p, d), jnp.bfloat16).at[:h0, :].set(
        w0.astype(jnp.bfloat16))                                         # (h0p, d)
    w1b = jnp.zeros((h1p, h0p), jnp.bfloat16).at[:h1, :h0].set(
        w1.astype(jnp.bfloat16))                                         # (h1p, h0p)
    w2b = jnp.zeros((kp, h1p), jnp.bfloat16).at[:k, :h1].set(
        w2.astype(jnp.bfloat16))                                         # (kp, h1p)
    b0r = jnp.zeros((1, h0p), jnp.float32).at[:, :h0].set(b0.astype(jnp.float32))
    b1r = jnp.zeros((1, h1p), jnp.float32).at[:, :h1].set(b1.astype(jnp.float32))
    b2r = jnp.zeros((1, kp), jnp.float32).at[:, :k].set(b2.astype(jnp.float32))

    # Batch tiling: grid over n, weights resident via constant index_map.
    tn = min(block_n, _round_up(n, 8))
    n_pad = _round_up(n, tn)
    xb = jnp.zeros((n_pad, d), jnp.bfloat16).at[:n, :].set(x.astype(jnp.bfloat16))

    grid = (n_pad // tn,)

    out = pl.pallas_call(
        f2_kernel,
        out_shape=jax.ShapeDtypeStruct((n_pad, kp), jnp.float32),
        grid_spec=pltpu.PrefetchScalarGridSpec(
            num_scalar_prefetch=0,
            grid=grid,
            in_specs=[
                pl.BlockSpec((tn, d), lambda i: (i, 0)),       # x  (tiled over n)
                pl.BlockSpec((h0p, d), lambda i: (0, 0)),      # w0 (resident)
                pl.BlockSpec((1, h0p), lambda i: (0, 0)),      # b0
                pl.BlockSpec((h1p, h0p), lambda i: (0, 0)),    # w1
                pl.BlockSpec((1, h1p), lambda i: (0, 0)),      # b1
                pl.BlockSpec((kp, h1p), lambda i: (0, 0)),     # w2
                pl.BlockSpec((1, kp), lambda i: (0, 0)),       # b2
            ],
            out_specs=pl.BlockSpec((tn, kp), lambda i: (i, 0)),
        ),
        compiler_params=pltpu.CompilerParams(
            dimension_semantics=("parallel",)),
    )(xb, w0b, b0r, w1b, b1r, w2b, b2r)

    # Strip the batch / class padding.
    return out[:n, :k]


if __name__ == "__main__":
    # Small shapes consistent with the module: n examples, d features,
    # hidden dims h0/h1, k classes.
    n, d, h0, h1, k = 8, 32, 64, 48, 10

    key = jax.random.PRNGKey(0)
    kx, k0, k1, k2, kb0, kb1, kb2 = jax.random.split(key, 7)

    # Deterministic init matching torch Uniform(-1/sqrt(d), 1/sqrt(d)).
    bound = 1.0 / math.sqrt(d)
    uni = lambda kk, shape: jax.random.uniform(
        kk, shape, dtype=jnp.float32, minval=-bound, maxval=bound)

    x = jax.random.normal(kx, (n, d), dtype=jnp.float32)
    w0 = uni(k0, (h0, d))
    w1 = uni(k1, (h1, h0))
    w2 = uni(k2, (k, h1))
    b0 = uni(kb0, (h0,))
    b1 = uni(kb1, (h1,))
    b2 = uni(kb2, (k,))

    out = f2_forward(x, w0, b0, w1, b1, w2, b2)
    out = jax.block_until_ready(out)

    # Pure-JAX f32 reference check (tolerance loosened for bf16 MXU inputs).
    ref = jnp.maximum(x @ w0.T + b0, 0.0)
    ref = jnp.maximum(ref @ w1.T + b1, 0.0)
    ref = ref @ w2.T + b2
    assert out.shape == (n, k)
    assert jnp.allclose(out, ref, atol=3e-2, rtol=3e-2), "mismatch vs reference"

    print("KERNEL_OK")
</pallas_src>

<mosaic_0001>
module attributes {stable_mosaic.version = 11 : i64} {
  func.func @f2_kernel(%arg0: i32, %arg1: memref<8x32xbf16, #tpu.memory_space<vmem>>, %arg2: memref<128x32xbf16, #tpu.memory_space<vmem>>, %arg3: memref<1x128xf32, #tpu.memory_space<vmem>>, %arg4: memref<128x128xbf16, #tpu.memory_space<vmem>>, %arg5: memref<1x128xf32, #tpu.memory_space<vmem>>, %arg6: memref<128x128xbf16, #tpu.memory_space<vmem>>, %arg7: memref<1x128xf32, #tpu.memory_space<vmem>>, %arg8: memref<8x128xf32, #tpu.memory_space<vmem>>) attributes {dimension_semantics = [#tpu.dimension_semantics<parallel>], iteration_bounds = array<i64: 1>, scalar_prefetch = 0 : i64, scratch_operands = 0 : i64, tpu.core_type = #tpu.core_type<tc>, window_params = [{transform_indices = @transform_0, window_bounds = array<i64: 8, 32>}, {pipeline_mode = #tpu.pipeline_mode<synchronous>, transform_indices = @transform_1, window_bounds = array<i64: 128, 32>}, {pipeline_mode = #tpu.pipeline_mode<synchronous>, transform_indices = @transform_2, window_bounds = array<i64: 1, 128>}, {pipeline_mode = #tpu.pipeline_mode<synchronous>, transform_indices = @transform_3, window_bounds = array<i64: 128, 128>}, {pipeline_mode = #tpu.pipeline_mode<synchronous>, transform_indices = @transform_4, window_bounds = array<i64: 1, 128>}, {pipeline_mode = #tpu.pipeline_mode<synchronous>, transform_indices = @transform_5, window_bounds = array<i64: 128, 128>}, {pipeline_mode = #tpu.pipeline_mode<synchronous>, transform_indices = @transform_6, window_bounds = array<i64: 1, 128>}, {transform_indices = @transform_7, window_bounds = array<i64: 8, 128>}]} {
    %c0 = arith.constant 0 : index
    %c0_0 = arith.constant 0 : index
    %0 = vector.load %arg1[%c0, %c0_0] : memref<8x32xbf16, #tpu.memory_space<vmem>>, vector<8x32xbf16>
    %c0_1 = arith.constant 0 : index
    %c0_2 = arith.constant 0 : index
    %1 = vector.load %arg2[%c0_1, %c0_2] : memref<128x32xbf16, #tpu.memory_space<vmem>>, vector<128x32xbf16>
    %cst = arith.constant dense<0.000000e+00> : vector<8x128xf32>
    %2 = tpu.matmul %0, %1, %cst {dimension_numbers = #tpu.dot_dimension_numbers<[1], [1], [0], [0], [0, 0, 1, 0], [], []>} : vector<8x32xbf16>, vector<128x32xbf16>, vector<8x128xf32> -> vector<8x128xf32>
    %c0_3 = arith.constant 0 : index
    %c0_4 = arith.constant 0 : index
    %3 = vector.load %arg3[%c0_3, %c0_4] : memref<1x128xf32, #tpu.memory_space<vmem>>, vector<1x128xf32>
    %4 = vector.broadcast %3 : vector<1x128xf32> to vector<8x128xf32>
    %5 = arith.addf %2, %4 : vector<8x128xf32>
    %cst_5 = arith.constant 0.000000e+00 : f32
    %6 = vector.broadcast %cst_5 : f32 to vector<8x128xf32>
    %7 = arith.maximumf %5, %6 : vector<8x128xf32>
    %8 = arith.truncf %7 : vector<8x128xf32> to vector<8x128xbf16>
    %c0_6 = arith.constant 0 : index
    %c0_7 = arith.constant 0 : index
    %9 = vector.load %arg4[%c0_6, %c0_7] : memref<128x128xbf16, #tpu.memory_space<vmem>>, vector<128x128xbf16>
    %cst_8 = arith.constant dense<0.000000e+00> : vector<8x128xf32>
    %10 = tpu.matmul %8, %9, %cst_8 {dimension_numbers = #tpu.dot_dimension_numbers<[1], [1], [0], [0], [0, 0, 1, 0], [], []>} : vector<8x128xbf16>, vector<128x128xbf16>, vector<8x128xf32> -> vector<8x128xf32>
    %c0_9 = arith.constant 0 : index
    %c0_10 = arith.constant 0 : index
    %11 = vector.load %arg5[%c0_9, %c0_10] : memref<1x128xf32, #tpu.memory_space<vmem>>, vector<1x128xf32>
    %12 = vector.broadcast %11 : vector<1x128xf32> to vector<8x128xf32>
    %13 = arith.addf %10, %12 : vector<8x128xf32>
    %cst_11 = arith.constant 0.000000e+00 : f32
    %14 = vector.broadcast %cst_11 : f32 to vector<8x128xf32>
    %15 = arith.maximumf %13, %14 : vector<8x128xf32>
    %16 = arith.truncf %15 : vector<8x128xf32> to vector<8x128xbf16>
    %c0_12 = arith.constant 0 : index
    %c0_13 = arith.constant 0 : index
    %17 = vector.load %arg6[%c0_12, %c0_13] : memref<128x128xbf16, #tpu.memory_space<vmem>>, vector<128x128xbf16>
    %cst_14 = arith.constant dense<0.000000e+00> : vector<8x128xf32>
    %18 = tpu.matmul %16, %17, %cst_14 {dimension_numbers = #tpu.dot_dimension_numbers<[1], [1], [0], [0], [0, 0, 1, 0], [], []>} : vector<8x128xbf16>, vector<128x128xbf16>, vector<8x128xf32> -> vector<8x128xf32>
    %c0_15 = arith.constant 0 : index
    %c0_16 = arith.constant 0 : index
    %19 = vector.load %arg7[%c0_15, %c0_16] : memref<1x128xf32, #tpu.memory_space<vmem>>, vector<1x128xf32>
    %20 = vector.broadcast %19 : vector<1x128xf32> to vector<8x128xf32>
    %21 = arith.addf %18, %20 : vector<8x128xf32>
    %c0_17 = arith.constant 0 : index
    %c0_18 = arith.constant 0 : index
    %22 = vector.load %arg8[%c0_17, %c0_18] : memref<8x128xf32, #tpu.memory_space<vmem>>, vector<8x128xf32>
    tpu.vector_store %arg8[%c0_17, %c0_18], %21 {strides = array<i32>} : memref<8x128xf32, #tpu.memory_space<vmem>>, vector<8x128xf32>,
    return
  }
  func.func @transform_0(%arg0: i32) -> (i32, i32) {
    %c0_i32 = arith.constant 0 : i32
    %c0_i32_0 = arith.constant 0 : i32
    return %arg0, %c0_i32 : i32, i32
  }
  func.func @transform_1(%arg0: i32) -> (i32, i32) {
    %c0_i32 = arith.constant 0 : i32
    %c0_i32_0 = arith.constant 0 : i32
    %c0_i32_1 = arith.constant 0 : i32
    return %c0_i32, %c0_i32_0 : i32, i32
  }
  func.func @transform_2(%arg0: i32) -> (i32, i32) {
    %c0_i32 = arith.constant 0 : i32
    %c0_i32_0 = arith.constant 0 : i32
    %c0_i32_1 = arith.constant 0 : i32
    return %c0_i32, %c0_i32_0 : i32, i32
  }
  func.func @transform_3(%arg0: i32) -> (i32, i32) {
    %c0_i32 = arith.constant 0 : i32
    %c0_i32_0 = arith.constant 0 : i32
    %c0_i32_1 = arith.constant 0 : i32
    return %c0_i32, %c0_i32_0 : i32, i32
  }
  func.func @transform_4(%arg0: i32) -> (i32, i32) {
    %c0_i32 = arith.constant 0 : i32
    %c0_i32_0 = arith.constant 0 : i32
    %c0_i32_1 = arith.constant 0 : i32
    return %c0_i32, %c0_i32_0 : i32, i32
  }
  func.func @transform_5(%arg0: i32) -> (i32, i32) {
    %c0_i32 = arith.constant 0 : i32
    %c0_i32_0 = arith.constant 0 : i32
    %c0_i32_1 = arith.constant 0 : i32
    return %c0_i32, %c0_i32_0 : i32, i32
  }
  func.func @transform_6(%arg0: i32) -> (i32, i32) {
    %c0_i32 = arith.constant 0 : i32
    %c0_i32_0 = arith.constant 0 : i32
    %c0_i32_1 = arith.constant 0 : i32
    return %c0_i32, %c0_i32_0 : i32, i32
  }
  func.func @transform_7(%arg0: i32) -> (i32, i32) {
    %c0_i32 = arith.constant 0 : i32
    %c0_i32_0 = arith.constant 0 : i32
    return %arg0, %c0_i32 : i32, i32
  }
}

</mosaic_0001>

<bundles_post_ra>
// kernel: tpu_custom_call.1
= control target key start
LH: loop header
LB: loop body
LE: loop exit
PB: predicated region body
PF: predicated region fallthrough
CT: control target
= control target key end

     0   :  { %12 = vsyncpa [#allocation3], 0  ;;  %s778_s0 = inlined_call_operand.vmem [shape: bf16[8,32], index: 0, kind: input, shape index: {}]   ;;  %s779_s1 = inlined_call_operand.vmem [shape: bf16[128,32], index: 1, kind: input, shape index: {}]   ;;  %s780_s2 = inlined_call_operand.vmem [shape: f32[1,128], index: 2, kind: input, shape index: {}]   ;;  %s781_s3 = inlined_call_operand.vmem [shape: bf16[128,128], index: 3, kind: input, shape index: {}]   ;;  %s782_s4 = inlined_call_operand.vmem [shape: f32[1,128], index: 4, kind: input, shape index: {}]   ;;  %s783_s5 = inlined_call_operand.hbm [shape: bf16[128,128], index: 5, kind: input, shape index: {}]   ;;  %s784_s6 = inlined_call_operand.vmem [shape: f32[1,128], index: 6, kind: input, shape index: {}]   ;;  %s785_s7 = inlined_call_operand.hbm [shape: f32[8,128], index: 7, kind: output, shape index: {}]  }
   0x1   :  { %13 = vsyncpa [#allocation4], 0  ;;  %s609_s24 = smov [#allocation2]   ;;  %s561_s28 = scalar_lea.hbm %s783_s5, 1024 }
   0x2   :  { %s29_s25 = sshll.u32 %s609_s24, 4  ;;  %p562_p0 = scmp.ne.s32.totalorder %s783_s5, %s561_s28  ;;  %s30_s25 = int_to_ptr.vmem [resolvable:$true] %s29_s25 }
   0x3   :  { %p565_p1 = scmp.lt.u32.totalorder %s561_s28, %s783_s5 }
   0x5   :  { %p567_p2 = pnand %p565_p1, %p562_p0 }
   0x7   :  { %570 = shalt.err (!%p567_p2)
}
   0x8   :  { %s571_s10 = scalar_lea.vmem %s30_s25, 1024  ;;  %p576_p4 = scmp.lt.s32.totalorder %s30_s25, %s30_s25 }
   0x9   :  { %p572_p3 = scmp.ne.s32.totalorder %s30_s25, %s571_s10  ;;  %p577_p5 = scmp.lt.s32.totalorder %s571_s10, %s571_s10 }
   0xb   :  { %p578_p6 = por %p577_p5, %p576_p4 }
   0xd   :  { %p579_p7 = pnand %p578_p6, %p572_p3 }
   0xf   :  { %582 = shalt.err (!%p579_p7)
}
  0x10   :  { %s610_s11 = smov 64   ;;  %s611_s12 = smov 4  }
  0x11   :  { %35 = dma.hbm_to_vmem [thread:$0]  %s783_s5, 1024, %s30_s25, [#allocation3], %s610_s11, %s610_s11, %s611_s12  }
  0x12   :  { %605 = dma.done.wait [#allocation3], 1024  }
  0x13   :  { %606 = vsyncadd [#allocation3], 4294966272  ;;  %v612_v0 = vmov 0.0   ;;  %vm613_vm0 = vmmov 0   ;;  %vm106_vm1 = vcmask 261120   ;;  %v537_v1 = vld [vmem:[%s779_s1] sm:$0xff]  }
  0x14   :  { %471 = vmatprep.subr.bf16.mxu0 %v612_v0  ;;  %487 = vmatprep.mubr.msk.bf16.mxu0 %vm613_vm0, %v612_v0  ;;  %v111_v2 = vsel %vm106_vm1, %v537_v1, 0  ;;  %v538_v3 = vld [vmem:[%s779_s1 + $0x8] sm:$0xff]   ;;  %v545_v5 = vld [vmem:[%s781_s3] sm:$0xff]   ;;  %v539_v6 = vld [vmem:[%s779_s1 + $0x10] sm:$0xff]   ;;  %s614_s26 = smov [#allocation5]  }
  0x15   :  { %491 = vmatprep.subr.bf16.mxu1 %v612_v0  ;;  %507 = vmatprep.mubr.msk.bf16.mxu1 %vm613_vm0, %v612_v0  ;;  %v114_v4 = vsel %vm106_vm1, %v538_v3, 0  ;;  %v546_v7 = vld [vmem:[%s781_s3 + $0x8] sm:$0xff]   ;;  %v117_v8 = vsel %vm106_vm1, %v539_v6, 0  ;;  %v540_v9 = vld [vmem:[%s779_s1 + $0x18] sm:$0xff]   ;;  %v547_v10 = vld [vmem:[%s781_s3 + $0x10] sm:$0xff]   ;;  %s407_s27 = sshll.u32 %s614_s26, 4  ;;  %s408_s27 = int_to_ptr.vmem [resolvable:$true] %s407_s27 }
  0x16   :  { %472 = vmatpush3.bf16.xpose.msra.mxu0 %v111_v2  ;;  %492 = vmatpush3.bf16.xpose.msra.mxu1 %v545_v5  ;;  %v120_v11 = vsel %vm106_vm1, %v540_v9, 0  ;;  %v541_v12 = vld [vmem:[%s779_s1 + $0x20] sm:$0xff]   ;;  %v548_v13 = vld [vmem:[%s781_s3 + $0x18] sm:$0xff]   ;;  %v542_v15 = vld [vmem:[%s779_s1 + $0x28] sm:$0xff]   ;;  %p588_p9 = scmp.lt.s32.totalorder %s408_s27, %s408_s27 }
  0x17   :  { %473 = vmatprep.subr.bf16.mxu0 %v612_v0  ;;  %493 = vmatprep.subr.bf16.mxu1 %v612_v0  ;;  %v123_v14 = vsel %vm106_vm1, %v541_v12, 0  ;;  %v549_v16 = vld [vmem:[%s781_s3 + $0x20] sm:$0xff]   ;;  %v126_v17 = vsel %vm106_vm1, %v542_v15, 0  ;;  %v543_v18 = vld [vmem:[%s779_s1 + $0x30] sm:$0xff]   ;;  %v550_v19 = vld [vmem:[%s781_s3 + $0x28] sm:$0xff]  }
  0x18   :  { %v129_v20 = vsel %vm106_vm1, %v543_v18, 0  ;;  %v544_v21 = vld [vmem:[%s779_s1 + $0x38] sm:$0xff]   ;;  %v551_v22 = vld [vmem:[%s781_s3 + $0x30] sm:$0xff]   ;;  %v42_v24 = vld [vmem:[%s778_s0] sm:$0xf] }
  0x19   :  { %v132_v23 = vsel %vm106_vm1, %v544_v21, 0  ;;  %v552_v25 = vld [vmem:[%s781_s3 + $0x38] sm:$0xff]   ;;  %v553_v26 = vld [vmem:[#allocation2] sm:$0xff]   ;;  %v554_v27 = vld [vmem:[#allocation2 + $0x8] sm:$0xff]  }
  0x1a   :  { %v555_v28 = vld [vmem:[#allocation2 + $0x10] sm:$0xff]   ;;  %v556_v29 = vld [vmem:[#allocation2 + $0x18] sm:$0xff]   ;;  %v557_v30 = vld [vmem:[#allocation2 + $0x20] sm:$0xff]  }
  0x1b   :  { %v558_v31 = vld [vmem:[#allocation2 + $0x28] sm:$0xff]   ;;  %v559_v32 = vld [vmem:[#allocation2 + $0x30] sm:$0xff]   ;;  %v416_v33 = vld [vmem:[%s780_s2] ss:$0 sm:$0xff] }
  0x1c   :  { %v560_v41 = vld [vmem:[#allocation2 + $0x38] sm:$0xff]   ;;  %v426_v42 = vld [vmem:[%s782_s4] ss:$0 sm:$0xff]  ;;  %s583_s4 = scalar_lea.vmem %s408_s27, 128 }
  0x1d   :  { %v435_v50 = vld [vmem:[%s784_s6] ss:$0 sm:$0xff]  ;;  %p584_p8 = scmp.ne.s32.totalorder %s408_s27, %s583_s4  ;;  %p589_p10 = scmp.lt.s32.totalorder %s583_s4, %s583_s4 }
  0x1e   :  { %474 = vmatpush3.bf16.xpose.msra.mxu0 %v114_v4  ;;  %494 = vmatpush3.bf16.xpose.msra.mxu1 %v546_v7 }
  0x1f   :  { %475 = vmatprep.subr.bf16.mxu0 %v612_v0  ;;  %495 = vmatprep.subr.bf16.mxu1 %v612_v0  ;;  %p590_p11 = por %p589_p10, %p588_p9 }
  0x21   :  { %p591_p12 = pnand %p590_p11, %p584_p8 }
  0x26   :  { %476 = vmatpush3.bf16.xpose.msra.mxu0 %v117_v8  ;;  %496 = vmatpush3.bf16.xpose.msra.mxu1 %v547_v10 }
  0x27   :  { %477 = vmatprep.subr.bf16.mxu0 %v612_v0  ;;  %497 = vmatprep.subr.bf16.mxu1 %v612_v0 }
  0x2e   :  { %478 = vmatpush3.bf16.xpose.msra.mxu0 %v120_v11  ;;  %498 = vmatpush3.bf16.xpose.msra.mxu1 %v548_v13 }
  0x2f   :  { %479 = vmatprep.subr.bf16.mxu0 %v612_v0  ;;  %499 = vmatprep.subr.bf16.mxu1 %v612_v0 }
  0x36   :  { %480 = vmatpush3.bf16.xpose.msra.mxu0 %v123_v14  ;;  %500 = vmatpush3.bf16.xpose.msra.mxu1 %v549_v16 }
  0x37   :  { %481 = vmatprep.subr.bf16.mxu0 %v612_v0  ;;  %501 = vmatprep.subr.bf16.mxu1 %v612_v0 }
  0x3e   :  { %482 = vmatpush3.bf16.xpose.msra.mxu0 %v126_v17  ;;  %502 = vmatpush3.bf16.xpose.msra.mxu1 %v550_v19 }
  0x3f   :  { %483 = vmatprep.subr.bf16.mxu0 %v612_v0  ;;  %503 = vmatprep.subr.bf16.mxu1 %v612_v0 }
  0x46   :  { %484 = vmatpush3.bf16.xpose.msra.mxu0 %v129_v20  ;;  %504 = vmatpush3.bf16.xpose.msra.mxu1 %v551_v22 }
  0x47   :  { %485 = vmatprep.subr.bf16.mxu0 %v612_v0  ;;  %505 = vmatprep.subr.bf16.mxu1 %v612_v0 }
  0x4e   :  { %486 = vmatpush3.bf16.xpose.msra.mxu0 %v132_v23  ;;  %506 = vmatpush3.bf16.xpose.msra.mxu1 %v552_v25 }
  0x4f   :  { %511 = vmatprep.subr.bf16.mxu0 %v612_v0 }
  0x55   :  { %488 = vmatmul.mubr.msk.bf16.vlgmr.msra.gmra.mrb[0].mxu0 %vm106_vm1, %v42_v24 }
  0x56   :  { %527 = vmatprep.mubr.msk.bf16.mxu0 %vm613_vm0, %v612_v0  ;;  %512 = vmatpush3.bf16.xpose.msra.mxu0 %v553_v26 }
  0x57   :  { %513 = vmatprep.subr.bf16.mxu0 %v612_v0 }
  0x5e   :  { %514 = vmatpush3.bf16.xpose.msra.mxu0 %v554_v27 }
  0x5f   :  { %515 = vmatprep.subr.bf16.mxu0 %v612_v0 }
  0x66   :  { %516 = vmatpush3.bf16.xpose.msra.mxu0 %v555_v28 }
  0x67   :  { %517 = vmatprep.subr.bf16.mxu0 %v612_v0 }
  0x6e   :  { %518 = vmatpush3.bf16.xpose.msra.mxu0 %v556_v29 }
  0x6f   :  { %519 = vmatprep.subr.bf16.mxu0 %v612_v0 }
  0x76   :  { %520 = vmatpush3.bf16.xpose.msra.mxu0 %v557_v30 }
  0x77   :  { %521 = vmatprep.subr.bf16.mxu0 %v612_v0 }
  0x7e   :  { %522 = vmatpush3.bf16.xpose.msra.mxu0 %v558_v31 }
  0x7f   :  { %523 = vmatprep.subr.bf16.mxu0 %v612_v0 }
  0x86   :  { %524 = vmatpush3.bf16.xpose.msra.mxu0 %v559_v32 }
  0x87   :  { %525 = vmatprep.subr.bf16.mxu0 %v612_v0 }
  0x8e   :  { %526 = vmatpush3.bf16.xpose.msra.mxu0 %v560_v41 }
 0x128   :  { %v168_v34 = vpop.f32.mrb[0].mxu0 }
 0x129   :  { %v169_v35 = vadd.f32 %v416_v33, %v168_v34  ;;  %v489_v36 = vpop.f32.mrb[1].mxu0 }
 0x12a   :  { %v171_v37 = vpop.f32.mrb[2].mxu0 }
 0x12b   :  { %v174_v38 = vmax.f32 %v169_v35, 0.0  ;;  %v490_v39 = vpop.f32.mrb[3].mxu0 }
 0x12d   :  { %v175_v40 = vpack.c.bf16 %v174_v38, %v174_v38 }
 0x12f   :  { %508 = vmatmul.mubr.bf16.vlgmr.msra.gmra.mrb[0].mxu1 %v175_v40 }
 0x202   :  { %v281_v43 = vpop.f32.mrb[0].mxu1 }
 0x203   :  { %v282_v44 = vadd.f32 %v426_v42, %v281_v43  ;;  %v509_v45 = vpop.f32.mrb[1].mxu1 }
 0x204   :  { %v284_v46 = vpop.f32.mrb[2].mxu1 }
 0x205   :  { %v287_v47 = vmax.f32 %v282_v44, 0.0  ;;  %v510_v48 = vpop.f32.mrb[3].mxu1 }
 0x207   :  { %v288_v49 = vpack.c.bf16 %v287_v47, %v287_v47 }
 0x209   :  { %528 = vmatmul.mubr.bf16.vlgmr.msra.gmra.mrb[4].mxu0 %v288_v49 }
 0x2dc   :  { %v394_v51 = vpop.f32.mrb[4].mxu0 }
 0x2dd   :  { %v395_v52 = vadd.f32 %v435_v50, %v394_v51  ;;  %v529_v53 = vpop.f32.mrb[5].mxu0 }
 0x2de   :  { %v397_v54 = vpop.f32.mrb[6].mxu0 }
 0x2df   :  { %400 = vst [vmem:[#allocation5] sm:$0xff] %v395_v52  ;;  %v530_v55 = vpop.f32.mrb[7].mxu0 }
 0x2e0   :  { %594 = shalt.err (!%p591_p12)
}
 0x2e1   :  { %s595_s6 = scalar_lea.hbm %s785_s7, 128 }
 0x2e2   :  { %p596_p13 = scmp.ne.s32.totalorder %s785_s7, %s595_s6  ;;  %p599_p0 = scmp.lt.u32.totalorder %s595_s6, %s785_s7 }
 0x2e4   :  { %p601_p1 = pnand %p599_p0, %p596_p13 }
 0x2e6   :  { %604 = shalt.err (!%p601_p1)
}
 0x2e7   :  { %410 = dma.vmem_to_hbm [thread:$0]  %s408_s27, 128, %s785_s7, [#allocation4]  }
 0x2e8   :  { %607 = dma.done.wait [#allocation4], 128  }
 0x2e9   :  { %608 = vsyncadd [#allocation4], 4294967168 }
 0x2ea   :  { %414 = vsyncpa [#allocation3], 1 }
 0x2eb   :  { %415 = vsyncpa [#allocation4], 1 }

</bundles_post_ra>
